<compile_context>
chip_gen: v7x
topology: tpu7x:2x2x1
jax: 0.10.0
libtpu: 0.0.40
codegen_flags: <defaults>
</compile_context>

<pallas_src>
import functools

import jax
import jax.numpy as jnp
import numpy as np
from jax.experimental import pallas as pl
from jax.experimental.pallas import tpu as pltpu


def _ctg_kernel(x_ref, w_ref, abd_ref, b_ref, o_ref, *, K):
    """One grid step computes the full output slab for one (n, time-tile).

    x_ref   (1, C_in,  T_TILE*V)      lane-dense input slab (pipelined)
    w_ref   (K, C_out, C_in)          1x1-conv weight, resident
    abd_ref (K, T_TILE*V, T_TILE*W)   block-diagonal adjacency, resident
    b_ref   (C_out, T_TILE*W)         folded conv bias (f32), resident
    o_ref   (1, C_out, T_TILE*W)      lane-dense output slab (pipelined)
    """
    x = x_ref[0]                                      # (C_in, T_TILE*V)
    acc = b_ref[...].astype(jnp.float32)              # (C_out, T_TILE*W) f32 accumulator
    for k in range(K):                                # K is small & static -> unrolled
        # Graph stage first (C_in <= K*C_out): one lane-dense MXU GEMM per k.
        z = jnp.dot(x, abd_ref[k], preferred_element_type=jnp.float32)
        # Channel stage: (C_out, C_in) @ (C_in, T_TILE*W), accumulate in f32.
        acc = acc + jnp.dot(w_ref[k], z.astype(w_ref.dtype),
                            preferred_element_type=jnp.float32)
    o_ref[0] = acc.astype(o_ref.dtype)


def _tpu_vmem_capacity_bytes():
    try:
        return int(pltpu.get_tpu_info().vmem_capacity_bytes)
    except Exception:
        return 64 << 20          # conservative (v7x-sized) fallback


def _vmem_budget_bytes():
    # ~1/4 of physical VMEM for the per-step working set: 32 MiB on v5e/v6e
    # (128 MiB physical), 16 MiB on v7x (64 MiB physical) — leaves headroom for
    # the compiler's own scratch and pipelining overhead.
    return _tpu_vmem_capacity_bytes() // 4


def _vmem_limit_bytes():
    # Raise the scoped-VMEM limit above the 16/32 MiB defaults but keep headroom.
    return min((_tpu_vmem_capacity_bytes() * 3) // 4, 96 << 20)


def _pick_t_tile(T, V, W, C_in, C_out, K, itemsize, budget):
    """Largest divisor of T whose blocks are lane-aligned (last dim % 128 == 0)
    and whose full per-step VMEM working set fits the budget.  Returns None if
    no lane-aligned divisor exists (caller may pad V/W)."""
    def est_bytes(d):
        tv, tw = d * V, d * W
        dbuf = 2 * itemsize * (C_in * tv + C_out * tw)                      # x + out, double-buffered
        resident = itemsize * (K * C_out * C_in + K * tv * tw) + 4 * C_out * tw   # weight + A_bd + bias(f32)
        interm = 4 * tw * (C_in + C_out)                                    # z + f32 accumulator
        return dbuf + resident + interm

    legal = [d for d in range(1, T + 1)
             if T % d == 0 and (d * V) % 128 == 0 and (d * W) % 128 == 0]
    if not legal:
        return None
    fitting = [d for d in legal if est_bytes(d) <= budget]
    return max(fitting) if fitting else min(legal)


def conv_temporal_graphical(x, A, weight, bias, *, t_tile=None, compute_dtype=None):
    """
    x:      (N, C_in, T, V)   conv input (PyTorch NCHW with H=T, W=V)
    A:      (K, V, W)         adjacency stack
    weight: (K*C_out, C_in)   1x1 conv weight (spatial dims squeezed), rows (k, c_out)
    bias:   (K*C_out,)
    returns (out, A) with out: (N, C_out, T, W)
    """
    # TODO(synk): non-default t_kernel_size/t_stride/t_padding/t_dilation (temporal
    # conv taps) are not implemented; defaults (1,1,0,1) match the reference module.
    N, C_in, T, V = x.shape
    K, Va, W = A.shape
    assert Va == V
    C_out = weight.shape[0] // K
    assert weight.shape == (K * C_out, C_in)
    assert bias.shape == (K * C_out,)

    cdt = jnp.dtype(compute_dtype) if compute_dtype is not None else x.dtype
    out_dtype = x.dtype
    itemsize = cdt.itemsize
    budget = _vmem_budget_bytes()

    V_pad, W_pad = V, W
    if t_tile is None:
        t_tile = _pick_t_tile(T, V, W, C_in, C_out, K, itemsize, budget)
        if t_tile is None:
            # No lane-aligned tiling for the raw V/W (e.g. skeleton graphs with
            # V=18/25): zero-pad V and W so the output stays lane-dense
            # (unmasked vst — the biggest measured lever) instead of masked
            # full-T stores.
            V_pad = max(8, pl.next_power_of_2(V))
            W_pad = max(8, pl.next_power_of_2(W))
            t_tile = _pick_t_tile(T, V_pad, W_pad, C_in, C_out, K, itemsize, budget)
        if t_tile is None:
            t_tile = T  # last-resort full-extent blocks (correct, slower: masked stores)
    else:
        assert T % t_tile == 0
        assert t_tile == T or ((t_tile * V) % 128 == 0 and (t_tile * W) % 128 == 0), (
            "t_tile must give lane-aligned blocks or cover the full T extent")

    # Zero-pad V/W if requested (correctness: padded x columns hit zero A rows;
    # padded output columns are produced as zeros and sliced off below).
    if (V_pad, W_pad) != (V, W):
        x = jnp.pad(x, ((0, 0), (0, 0), (0, 0), (0, V_pad - V)))
        A_p = jnp.pad(A, ((0, 0), (0, V_pad - V), (0, W_pad - W)))
    else:
        A_p = A

    tV, tW = t_tile * V_pad, t_tile * W_pad

    # Fold the conv bias through the graph contraction (kept in f32, added to the
    # f32 accumulator before the final cast):
    #   bias_cw[c, w] = sum_k bias[k*C_out + c] * sum_v A[k, v, w]
    bias_cw = jnp.einsum('kc,kw->cw',
                         bias.reshape(K, C_out).astype(jnp.float32),
                         A_p.sum(axis=1).astype(jnp.float32))
    bias_tile = jnp.tile(bias_cw, (1, t_tile))                       # (C_out, tW) f32

    # Block-diagonal adjacency tile: A_bd[k, t*V+v, s*W+w] = (t==s) * A[k, v, w].
    eye_t = jnp.eye(t_tile, dtype=cdt)
    A_bd = jnp.einsum('ts,kvw->ktvsw', eye_t, A_p.astype(cdt)).reshape(K, tV, tW)

    w_kcc = weight.reshape(K, C_out, C_in).astype(cdt)               # rows are (k, c_out)
    x_flat = x.reshape(N, C_in, T * V_pad).astype(cdt)               # free reshape, lane-dense

    # Advisory cost estimate (block-diag graph GEMM + channel GEMM, streamed bytes).
    steps = N * (T // t_tile)
    flops = 2 * steps * K * (C_in * tV * tW + C_out * C_in * tW)
    bytes_accessed = (x_flat.size * x_flat.dtype.itemsize
                      + N * C_out * T * W_pad * jnp.dtype(out_dtype).itemsize
                      + w_kcc.size * w_kcc.dtype.itemsize
                      + A_bd.size * A_bd.dtype.itemsize
                      + bias_tile.size * 4)

    out_flat = pl.pallas_call(
        functools.partial(_ctg_kernel, K=K),
        out_shape=jax.ShapeDtypeStruct((N, C_out, T * W_pad), out_dtype),
        grid=(N, T // t_tile),
        in_specs=[
            pl.BlockSpec((1, C_in, tV), lambda n, t: (n, 0, t)),
            pl.BlockSpec((K, C_out, C_in), lambda n, t: (0, 0, 0)),
            pl.BlockSpec((K, tV, tW), lambda n, t: (0, 0, 0)),
            pl.BlockSpec((C_out, tW), lambda n, t: (0, 0)),
        ],
        out_specs=pl.BlockSpec((1, C_out, tW), lambda n, t: (n, 0, t)),
        compiler_params=pltpu.CompilerParams(
            dimension_semantics=("parallel", "parallel"),
            vmem_limit_bytes=_vmem_limit_bytes()),
        cost_estimate=pl.CostEstimate(flops=int(flops), transcendentals=0,
                                      bytes_accessed=int(bytes_accessed)),
    )(x_flat, w_kcc, A_bd, bias_tile)

    out = out_flat.reshape(N, C_out, T, W_pad)
    if W_pad != W:
        out = out[..., :W]
    return out, A


def _reference(x, A, weight, bias):
    """Pure-JAX reference mirroring the PyTorch forward."""
    N, C_in, T, V = x.shape
    K = A.shape[0]
    C_out = weight.shape[0] // K
    y = jnp.einsum('oc,nctv->notv', weight, x) + bias[None, :, None, None]
    y = y.reshape(N, K, C_out, T, V)
    return jnp.einsum('nkctv,kvw->nctw', y, A)


if __name__ == "__main__":
    # Small shapes consistent with the module (ST-GCN style graph conv).
    N, C_in, C_out, T, V, K = 2, 4, 8, 16, 16, 3
    key = jax.random.PRNGKey(0)
    kx, ka, kw, kb = jax.random.split(key, 4)

    x = jax.random.normal(kx, (N, C_in, T, V), dtype=jnp.float32)
    A = jax.random.normal(ka, (K, V, V), dtype=jnp.float32)
    # Synthetic nn.Conv2d(C_in, K*C_out, (1,1), bias=True) parameters.
    weight = jax.random.normal(kw, (K * C_out, C_in), dtype=jnp.float32) * 0.1
    bias = jax.random.normal(kb, (K * C_out,), dtype=jnp.float32) * 0.1

    ref = _reference(x, A, weight, bias)

    # 1) Explicit t_tile=8: grid = (N, 2), 128-lane x/out slabs (multi-block T path).
    out, A_out = conv_temporal_graphical(x, A, weight, bias, t_tile=8)
    out = jax.block_until_ready(out)
    np.testing.assert_allclose(np.asarray(out), np.asarray(ref), rtol=1e-4, atol=1e-4)
    assert out.shape == (N, C_out, T, V)
    assert A_out.shape == A.shape

    # 2) Automatic tile selection (largest VMEM-fitting lane-aligned slab).
    out2, _ = conv_temporal_graphical(x, A, weight, bias)
    out2 = jax.block_until_ready(out2)
    np.testing.assert_allclose(np.asarray(out2), np.asarray(ref), rtol=1e-4, atol=1e-4)

    # 3) Non-lane-friendly graph size (V=12) exercises the zero-padding path
    #    (skeleton graphs with V=18/25 take the same route).
    V2 = 12
    x2 = jax.random.normal(kx, (N, C_in, T, V2), dtype=jnp.float32)
    A2 = jax.random.normal(ka, (K, V2, V2), dtype=jnp.float32)
    ref2 = _reference(x2, A2, weight, bias)
    out3, _ = conv_temporal_graphical(x2, A2, weight, bias)
    out3 = jax.block_until_ready(out3)
    np.testing.assert_allclose(np.asarray(out3), np.asarray(ref2), rtol=1e-4, atol=1e-4)

    print("KERNEL_OK")
</pallas_src>

<mosaic_0001>
module attributes {stable_mosaic.version = 11 : i64} {
  func.func @_ctg_kernel(%arg0: i32, %arg1: i32, %arg2: memref<1x4x128xf32, #tpu.memory_space<vmem>>, %arg3: memref<3x8x4xf32, #tpu.memory_space<vmem>>, %arg4: memref<3x128x128xf32, #tpu.memory_space<vmem>>, %arg5: memref<8x128xf32, #tpu.memory_space<vmem>>, %arg6: memref<1x8x128xf32, #tpu.memory_space<vmem>>) attributes {dimension_semantics = [#tpu.dimension_semantics<parallel>, #tpu.dimension_semantics<parallel>], iteration_bounds = array<i64: 2, 2>, scalar_prefetch = 0 : i64, scratch_operands = 0 : i64, tpu.core_type = #tpu.core_type<tc>, window_params = [{transform_indices = @transform_0, window_bounds = array<i64: 1, 4, 128>}, {pipeline_mode = #tpu.pipeline_mode<synchronous>, transform_indices = @transform_1, window_bounds = array<i64: 3, 8, 4>}, {pipeline_mode = #tpu.pipeline_mode<synchronous>, transform_indices = @transform_2, window_bounds = array<i64: 3, 128, 128>}, {pipeline_mode = #tpu.pipeline_mode<synchronous>, transform_indices = @transform_3, window_bounds = array<i64: 8, 128>}, {transform_indices = @transform_4, window_bounds = array<i64: 1, 8, 128>}]} {
    %c0 = arith.constant 0 : index
    %c0_0 = arith.constant 0 : index
    %c0_1 = arith.constant 0 : index
    %0 = vector.load %arg2[%c0, %c0_0, %c0_1] : memref<1x4x128xf32, #tpu.memory_space<vmem>>, vector<1x4x128xf32>
    %1 = vector.shape_cast %0 : vector<1x4x128xf32> to vector<4x128xf32>
    %c0_2 = arith.constant 0 : index
    %c0_3 = arith.constant 0 : index
    %2 = vector.load %arg5[%c0_2, %c0_3] : memref<8x128xf32, #tpu.memory_space<vmem>>, vector<8x128xf32>
    %c0_4 = arith.constant 0 : index
    %c0_5 = arith.constant 0 : index
    %c0_6 = arith.constant 0 : index
    %3 = vector.load %arg4[%c0_4, %c0_5, %c0_6] : memref<3x128x128xf32, #tpu.memory_space<vmem>>, vector<1x128x128xf32>
    %4 = vector.shape_cast %3 : vector<1x128x128xf32> to vector<128x128xf32>
    %cst = arith.constant dense<0.000000e+00> : vector<4x128xf32>
    %5 = tpu.matmul %1, %4, %cst {dimension_numbers = #tpu.dot_dimension_numbers<[1], [0], [0], [1], [0, 0, 1, 1], [], []>} : vector<4x128xf32>, vector<128x128xf32>, vector<4x128xf32> -> vector<4x128xf32>
    %c0_7 = arith.constant 0 : index
    %c0_8 = arith.constant 0 : index
    %c0_9 = arith.constant 0 : index
    %6 = vector.load %arg3[%c0_7, %c0_8, %c0_9] : memref<3x8x4xf32, #tpu.memory_space<vmem>>, vector<1x8x4xf32>
    %7 = vector.shape_cast %6 : vector<1x8x4xf32> to vector<8x4xf32>
    %cst_10 = arith.constant dense<0.000000e+00> : vector<8x128xf32>
    %8 = tpu.matmul %7, %5, %cst_10 {dimension_numbers = #tpu.dot_dimension_numbers<[1], [0], [0], [1], [0, 0, 1, 1], [], []>} : vector<8x4xf32>, vector<4x128xf32>, vector<8x128xf32> -> vector<8x128xf32>
    %9 = arith.addf %2, %8 : vector<8x128xf32>
    %c1 = arith.constant 1 : index
    %c0_11 = arith.constant 0 : index
    %c0_12 = arith.constant 0 : index
    %10 = vector.load %arg4[%c1, %c0_11, %c0_12] : memref<3x128x128xf32, #tpu.memory_space<vmem>>, vector<1x128x128xf32>
    %11 = vector.shape_cast %10 : vector<1x128x128xf32> to vector<128x128xf32>
    %cst_13 = arith.constant dense<0.000000e+00> : vector<4x128xf32>
    %12 = tpu.matmul %1, %11, %cst_13 {dimension_numbers = #tpu.dot_dimension_numbers<[1], [0], [0], [1], [0, 0, 1, 1], [], []>} : vector<4x128xf32>, vector<128x128xf32>, vector<4x128xf32> -> vector<4x128xf32>
    %c1_14 = arith.constant 1 : index
    %c0_15 = arith.constant 0 : index
    %c0_16 = arith.constant 0 : index
    %13 = vector.load %arg3[%c1_14, %c0_15, %c0_16] : memref<3x8x4xf32, #tpu.memory_space<vmem>>, vector<1x8x4xf32>
    %14 = vector.shape_cast %13 : vector<1x8x4xf32> to vector<8x4xf32>
    %cst_17 = arith.constant dense<0.000000e+00> : vector<8x128xf32>
    %15 = tpu.matmul %14, %12, %cst_17 {dimension_numbers = #tpu.dot_dimension_numbers<[1], [0], [0], [1], [0, 0, 1, 1], [], []>} : vector<8x4xf32>, vector<4x128xf32>, vector<8x128xf32> -> vector<8x128xf32>
    %16 = arith.addf %9, %15 : vector<8x128xf32>
    %c2 = arith.constant 2 : index
    %c0_18 = arith.constant 0 : index
    %c0_19 = arith.constant 0 : index
    %17 = vector.load %arg4[%c2, %c0_18, %c0_19] : memref<3x128x128xf32, #tpu.memory_space<vmem>>, vector<1x128x128xf32>
    %18 = vector.shape_cast %17 : vector<1x128x128xf32> to vector<128x128xf32>
    %cst_20 = arith.constant dense<0.000000e+00> : vector<4x128xf32>
    %19 = tpu.matmul %1, %18, %cst_20 {dimension_numbers = #tpu.dot_dimension_numbers<[1], [0], [0], [1], [0, 0, 1, 1], [], []>} : vector<4x128xf32>, vector<128x128xf32>, vector<4x128xf32> -> vector<4x128xf32>
    %c2_21 = arith.constant 2 : index
    %c0_22 = arith.constant 0 : index
    %c0_23 = arith.constant 0 : index
    %20 = vector.load %arg3[%c2_21, %c0_22, %c0_23] : memref<3x8x4xf32, #tpu.memory_space<vmem>>, vector<1x8x4xf32>
    %21 = vector.shape_cast %20 : vector<1x8x4xf32> to vector<8x4xf32>
    %cst_24 = arith.constant dense<0.000000e+00> : vector<8x128xf32>
    %22 = tpu.matmul %21, %19, %cst_24 {dimension_numbers = #tpu.dot_dimension_numbers<[1], [0], [0], [1], [0, 0, 1, 1], [], []>} : vector<8x4xf32>, vector<4x128xf32>, vector<8x128xf32> -> vector<8x128xf32>
    %23 = arith.addf %16, %22 : vector<8x128xf32>
    %c0_25 = arith.constant 0 : index
    %c0_26 = arith.constant 0 : index
    %c0_27 = arith.constant 0 : index
    %24 = vector.load %arg6[%c0_25, %c0_26, %c0_27] : memref<1x8x128xf32, #tpu.memory_space<vmem>>, vector<1x8x128xf32>
    %25 = vector.shape_cast %24 : vector<1x8x128xf32> to vector<8x128xf32>
    %26 = vector.shape_cast %23 : vector<8x128xf32> to vector<1x8x128xf32>
    tpu.vector_store %arg6[%c0_25, %c0_26, %c0_27], %26 {strides = array<i32>} : memref<1x8x128xf32, #tpu.memory_space<vmem>>, vector<1x8x128xf32>,
    return
  }
  func.func @transform_0(%arg0: i32, %arg1: i32) -> (i32, i32, i32) {
    %c0_i32 = arith.constant 0 : i32
    %c0_i32_0 = arith.constant 0 : i32
    return %arg0, %c0_i32, %arg1 : i32, i32, i32
  }
  func.func @transform_1(%arg0: i32, %arg1: i32) -> (i32, i32, i32) {
    %c0_i32 = arith.constant 0 : i32
    %c0_i32_0 = arith.constant 0 : i32
    %c0_i32_1 = arith.constant 0 : i32
    %c0_i32_2 = arith.constant 0 : i32
    return %c0_i32, %c0_i32_0, %c0_i32_1 : i32, i32, i32
  }
  func.func @transform_2(%arg0: i32, %arg1: i32) -> (i32, i32, i32) {
    %c0_i32 = arith.constant 0 : i32
    %c0_i32_0 = arith.constant 0 : i32
    %c0_i32_1 = arith.constant 0 : i32
    %c0_i32_2 = arith.constant 0 : i32
    return %c0_i32, %c0_i32_0, %c0_i32_1 : i32, i32, i32
  }
  func.func @transform_3(%arg0: i32, %arg1: i32) -> (i32, i32) {
    %c0_i32 = arith.constant 0 : i32
    %c0_i32_0 = arith.constant 0 : i32
    %c0_i32_1 = arith.constant 0 : i32
    return %c0_i32, %c0_i32_0 : i32, i32
  }
  func.func @transform_4(%arg0: i32, %arg1: i32) -> (i32, i32, i32) {
    %c0_i32 = arith.constant 0 : i32
    %c0_i32_0 = arith.constant 0 : i32
    return %arg0, %c0_i32, %arg1 : i32, i32, i32
  }
}

</mosaic_0001>

<bundles_post_ra>
// kernel: tpu_custom_call.1
= control target key start
LH: loop header
LB: loop body
LE: loop exit
PB: predicated region body
PF: predicated region fallthrough
CT: control target
= control target key end

     0   :  { %9 = vsyncpa [#allocation3], 0  ;;  %s1604_s0 = inlined_call_operand.vmem [shape: f32[2,4,256], index: 0, kind: input, shape index: {}]   ;;  %s1605_s1 = inlined_call_operand.vmem [shape: f32[3,8,4], index: 1, kind: input, shape index: {}]   ;;  %s1606_s2 = inlined_call_operand.hbm [shape: f32[3,128,128], index: 2, kind: input, shape index: {}]   ;;  %s1607_s3 = inlined_call_operand.vmem [shape: f32[8,128], index: 3, kind: input, shape index: {}]   ;;  %s1608_s4 = inlined_call_operand.hbm [shape: f32[2,8,256], index: 4, kind: output, shape index: {}]  }
   0x1   :  { %10 = vsyncpa [#allocation4], 0 }
   0x2   :  { %12 = vsyncpa [#allocation4 + $0x1], 0  ;;  %s1367_s15 = smov 0   ;;  %s1369_s16 = smov 0  }
   0x3   :  { %s1371_s17 = smov 0   ;;  %s1373_s18 = smov 0  }
   0x4   :  { %s1375_s19 = smov 0   ;;  %s1377_s20 = smov 0  }
   0x5   :  { %s1379_s21 = smov 0   ;;  %s1381_s22 = smov 0  }
   0x6 LB: > { %s843_s23 = sadd.s32 4294967295, %s1333_s22   ;;  %s844_s24 = sadd.s32 4294967294, %s1333_s22   ;;  %s1333_s22 = sphi %s1381_s22, %s18_s22   ;;  %s1329_s21 = sphi %s1379_s21, %s1628_s21   ;;  %s1325_s20 = sphi %s1377_s20, %s1627_s20   ;;  %s1321_s19 = sphi %s1375_s19, %s1626_s19   ;;  %s1317_s18 = sphi %s1373_s18, %s1625_s18   ;;  %s1313_s17 = sphi %s1371_s17, %s1624_s17   ;;  %s1309_s16 = sphi %s1369_s16, %s1623_s16   ;;  %s1305_s15 = sphi %s1367_s15, %s1622_s15  }
   0x7   : > { %s27_s25 = sadd.s32 1, %s1325_s20  ;;  %s30_s26 = sadd.s32 1, %s1329_s21 }
   0x8   : > { %p28_p0 = scmp.ge.s32.totalorder %s27_s25, 2  ;;  %s130_s27 = sadd.s32 1, %s1313_s17 }
   0x9   : > { %p140_p1 = scmp.ne.s32.totalorder %s1313_s17, %s1309_s16  ;;  %p141_p2 = scmp.eq.s32.totalorder %s843_s23, 3 }
   0xa   : > { %s1630_s25 = smov (%p28_p0, %s27_s25), 0  ;;  %s1632_s26 = smov (!%p28_p0, %s30_s26), %s1329_s21 }
   0xb   : > { %s126_s28 = ssub.s32 %s1325_s20, %s1630_s25  ;;  %p1419_p3 = por %p141_p2, %p140_p1 }
   0xc   : > { %p32_p4 = scmp.ge.s32.totalorder %s1632_s26, 2  ;;  %p146_p5 = scmp.ne.s32.totalorder %s1309_s16, %s1305_s15 }
   0xd   : > { %s1613_s29 = scalar_select %p1419_p3, 1, 0 }
   0xe   : > { %p147_p6 = scmp.eq.s32.totalorder %s844_s24, 3  ;;  %p845_p7 = scmp.ge.s32.totalorder %s1333_s22, 1 }
   0xf   : > { %s1634_s26 = smov (%p32_p4, %s1632_s26), 0  ;;  %p154_p9 = scmp.lt.s32.totalorder %s1333_s22, 5 }
  0x10   : > { %p1428_p8 = por %p147_p6, %p146_p5  ;;  %s125_s5 = ssub.s32 %s1329_s21, %s1634_s26 }
  0x11   : > { %s127_s6 = sor.u32 %s126_s28, %s125_s5  ;;  %p1435_p10 = pnand %p845_p7, %p154_p9 }
  0x12   : > { %s1614_s30 = scalar_select %p1428_p8, 1, 0 }
  0x13   : > { %s1615_s7 = scalar_select %p1435_p10, 1, 0 }
  0x14   : > { %p128_p11 = scmp.eq.s32.totalorder %s127_s6, 0  ;;  %p1439_p12 = scmp.eq.s32.totalorder %s843_s23, 0 }
  0x15   : > { %p1126_p13 = pneg %p1435_p10  ;;  %s1335_s10 = smov [#allocation2]  }
  0x16   : > { %s1616_s8 = scalar_select %p1439_p12, 1, 0 }
  0x17   : > { %s1446_s9 = scalar_select %p128_p11, %s1313_s17, %s130_s27  }
  0x18   : > { %s169_s11 = sshll.u32 %s1335_s10, 4  ;;  %p1450_p0 = pnand %p1439_p12, %p1126_p13  ;;  %s170_s11 = int_to_ptr.vmem [resolvable:$true] %s169_s11 }
  0x19   : > { %s1207_s23 = scalar_lea.hbm %s1606_s2, 6144 }
  0x1a   : > { %p1208_p1 = scmp.ne.s32.totalorder %s1606_s2, %s1207_s23  ;;  %p1209_p2 = pneg %p1450_p0 }
  0x1b   : > { %p1214_p6 = scmp.lt.u32.totalorder %s1207_s23, %s1606_s2 }
  0x1c   : > { %p1210_p4 = pnand %p1209_p2, %p1208_p1 }
  0x1e   : > { %p1211_p5 = pneg %p1210_p4 }
  0x20   : > { %p1216_p7 = pnand %p1214_p6, %p1211_p5 }
  0x22   : > { %1219 = shalt.err (!%p1216_p7)
}
  0x23   : > { %s1220_s6 = scalar_lea.vmem %s170_s11, 6144  ;;  %p1228_p8 = scmp.lt.s32.totalorder %s170_s11, %s170_s11 }
  0x24   : > { %p1221_p9 = scmp.ne.s32.totalorder %s170_s11, %s1220_s6  ;;  %p1229_p3 = scmp.lt.s32.totalorder %s1220_s6, %s1220_s6 }
  0x26   : > { %p1223_p11 = pnand %p1221_p9, %p1209_p2  ;;  %p1230_p12 = por %p1229_p3, %p1228_p8 }
  0x28   : > { %p1224_p13 = pneg %p1223_p11 }
  0x2a   : > { %p1231_p10 = pnand %p1230_p12, %p1224_p13 }
  0x2c   : > { %1234 = shalt.err (!%p1231_p10)
}
  0x2d   : > { %s1336_s10 = smov 128   ;;  %s1337_s13 = smov 8  }
  0x2e   : > { %1129 = dma.hbm_to_vmem [thread:$0]  (!%p1450_p0), %s1606_s2, 6144, %s170_s11, [#allocation3], %s1336_s10, %s1336_s10, %s1337_s13  }
  0x2f   : > { %p1618_p1 = scmp.ne.s32.totalorder %s1615_s7, 0 }
  0x30   : > { %p1619_p4 = scmp.ne.s32.totalorder (!%p1618_p1), %s1616_s8, 0 }
  0x31   : > { %199 = sbr.rel (%p1618_p1) target bundleno = 786 (0x312), region = 36 }
  0x38   : > { %1296 = dma.done.wait (%p1619_p4), [#allocation3], 6144  }
  0x39   : > { %1298 = vsyncadd (%p1619_p4), [#allocation3], 4294961152  ;;  %v1338_v0 = vmov 0.0|0.0   ;;  %vm1339_vm0 = vmmov 0   ;;  %v1340_v1 = vmov 0.0   ;;  %v238_v2 = vld [vmem:[#allocation2] sm:$0xff] }
  0x3a   : > { %1043 = vmatprep.subr.bf16.mxu0 %v1338_v0  ;;  %955 = vmatprep.mubr.msk.f32.mxu0 %vm1339_vm0, %v1340_v1  ;;  %v239_v3 = vld [vmem:[#allocation2 + $0x8] sm:$0xff]  ;;  %v240_v4 = vld [vmem:[#allocation2 + $0x10] sm:$0xff]  ;;  %v241_v6 = vld [vmem:[#allocation2 + $0x18] sm:$0xff]  ;;  %p228_p3 = scmp.lt.s32.totalorder %s1321_s19, 1  ;;  %p230_p8 = scmp.lt.s32.totalorder %s1317_s18, 1  ;;  %vm329_vm1 = vcmask 1043456  }
  0x3b   : > { %958 = vmatprep.subr.mxu1 %v1340_v1  ;;  %960 = vmatprep.mubr.msk.f32.mxu1 %vm1339_vm0, %v1340_v1  ;;  %v1044_v5 = vpack.c.bf16 %v239_v3, %v238_v2  ;;  %v1047_v7 = vpack.c.bf16 %v241_v6, %v240_v4  ;;  %v242_v8 = vld [vmem:[#allocation2 + $0x20] sm:$0xff]  ;;  %v243_v9 = vld [vmem:[#allocation2 + $0x28] sm:$0xff]  ;;  %v244_v11 = vld [vmem:[#allocation2 + $0x30] sm:$0xff]  ;;  %vm325_vm2 = vcmask 31744   ;;  %p1620_p12 = scmp.ne.s32.totalorder %s1613_s29, 0 }
  0x3c   : > { %v1050_v10 = vpack.c.bf16 %v243_v9, %v242_v8  ;;  %v245_v12 = vld [vmem:[#allocation2 + $0x38] sm:$0xff]  ;;  %v246_v14 = vld [vmem:[#allocation2 + $0x40] sm:$0xff]  ;;  %v247_v15 = vld [vmem:[#allocation2 + $0x48] sm:$0xff]  ;;  %s229_s7 = scalar_select %p228_p3, %s1321_s19, 1 }
  0x3d   : > { %1045 = vmatpush3.bf16.msra.mxu0 %v1044_v5  ;;  %v1053_v13 = vpack.c.bf16 %v245_v12, %v244_v11  ;;  %v1056_v16 = vpack.c.bf16 %v247_v15, %v246_v14  ;;  %v248_v17 = vld [vmem:[#allocation2 + $0x50] sm:$0xff]  ;;  %v249_v18 = vld [vmem:[#allocation2 + $0x58] sm:$0xff]  ;;  %s231_s8 = scalar_select %p230_p8, %s1317_s18, 1  ;;  %v250_v20 = vld [vmem:[#allocation2 + $0x60] sm:$0xff] }
  0x3e   : > { %1046 = vmatprep.subr.bf16.mxu0 %v1338_v0  ;;  %v1059_v19 = vpack.c.bf16 %v249_v18, %v248_v17  ;;  %s851_s11 = sshll.u32 %s229_s7, 1  ;;  %v251_v21 = vld [vmem:[#allocation2 + $0x68] sm:$0xff]  ;;  %v252_v23 = vld [vmem:[#allocation2 + $0x70] sm:$0xff]  ;;  %v253_v24 = vld [vmem:[#allocation2 + $0x78] sm:$0xff]  ;;  %s1341_s7 = smov [#allocation5]  }
  0x3f   : > { %s233_s12 = sadd.s32 %s851_s11, %s231_s8  ;;  %v1062_v22 = vpack.c.bf16 %v251_v21, %v250_v20  ;;  %v1065_v25 = vpack.c.bf16 %v253_v24, %v252_v23  ;;  %v571_v27 = vld [vmem:[#allocation2 + $0x100] sm:$0xff]  ;;  %v572_v28 = vld [vmem:[#allocation2 + $0x108] sm:$0xff]  ;;  %v573_v30 = vld [vmem:[#allocation2 + $0x110] sm:$0xff]  ;;  %s225_s8 = sand.u32 1, %s1309_s16  }
  0x40   : > { %s852_s23 = sshll.u32 %s233_s12, 2  ;;  %v1092_v29 = vpack.c.bf16 %v572_v28, %v571_v27  ;;  %v574_v31 = vld [vmem:[#allocation2 + $0x118] sm:$0xff]  ;;  %v575_v33 = vld [vmem:[#allocation2 + $0x120] sm:$0xff]  ;;  %v576_v34 = vld [vmem:[#allocation2 + $0x128] sm:$0xff]  ;;  %s850_s11 = sshll.u32 %s225_s8, 3 }
  0x41   : > { %1048 = vmatpush3.bf16.msra.mxu0 %v1047_v7  ;;  %s235_s5 = scalar_lea.vmem %s1604_s0, %s852_s23  ;;  %v1095_v32 = vpack.c.bf16 %v574_v31, %v573_v30  ;;  %v1098_v35 = vpack.c.bf16 %v576_v34, %v575_v33  ;;  %v577_v36 = vld [vmem:[#allocation2 + $0x130] sm:$0xff]  ;;  %v578_v37 = vld [vmem:[#allocation2 + $0x138] sm:$0xff]  ;;  %v579_v39 = vld [vmem:[#allocation2 + $0x140] sm:$0xff]  ;;  %s862_s12 = sshll.u32 %s1321_s19, 1 }
  0x42   : > { %1049 = vmatprep.subr.bf16.mxu0 %v1338_v0  ;;  %v1496_v26 = vld [vmem:[%s235_s5] sm:$0xf]  ;;  %v1101_v38 = vpack.c.bf16 %v578_v37, %v577_v36  ;;  %v580_v40 = vld [vmem:[#allocation2 + $0x148] sm:$0xff]  ;;  %v581_v42 = vld [vmem:[#allocation2 + $0x150] sm:$0xff]  ;;  %s749_s23 = sadd.s32 %s1317_s18, %s862_s12  ;;  %s227_s6 = scalar_lea.vmem [#allocation5], %s850_s11 }
  0x43   : > { %v1104_v41 = vpack.c.bf16 %v580_v40, %v579_v39  ;;  %v582_v43 = vld [vmem:[#allocation2 + $0x158] sm:$0xff]  ;;  %v583_v45 = vld [vmem:[#allocation2 + $0x160] sm:$0xff]  ;;  %v584_v46 = vld [vmem:[#allocation2 + $0x168] sm:$0xff]  ;;  %s863_s5 = sshll.u32 %s749_s23, 7  ;;  %s753_s10 = sshll.u32 %s227_s6, 4  ;;  %s1553_s10 = int_to_ptr.vmem [resolvable:$true] %s753_s10 }
  0x44   : > { %v1107_v44 = vpack.c.bf16 %v582_v43, %v581_v42  ;;  %v1110_v47 = vpack.c.bf16 %v584_v46, %v583_v45  ;;  %v585_v48 = vld [vmem:[#allocation2 + $0x170] sm:$0xff]  ;;  %v586_v49 = vld [vmem:[#allocation2 + $0x178] sm:$0xff]  ;;  %v405_v51 = vld [vmem:[#allocation2 + $0x80] sm:$0xff]  ;;  %s1551_s24 = scalar_lea.hbm %s1608_s4, %s863_s5  ;;  %s738_s18 = scalar_lea.sflag [#allocation4], %s225_s8 }
  0x45   : > { %1051 = vmatpush3.bf16.msra.mxu0 %v1050_v10  ;;  %v1113_v50 = vpack.c.bf16 %v586_v49, %v585_v48  ;;  %v406_v52 = vld [vmem:[#allocation2 + $0x88] sm:$0xff]  ;;  %v324_v53 = vld [vmem:[%s1605_s1] sm:$0xff]  ;;  %v407_v56 = vld [vmem:[#allocation2 + $0x90] sm:$0xff]  ;;  %s1235_s19 = scalar_lea.vmem %s1553_s10, 128  ;;  %s1239_s11 = sshll.u32 %s1341_s7, 4  ;;  %s1240_s11 = int_to_ptr.vmem [resolvable:$false] %s1239_s11 }
  0x46   : > { %1052 = vmatprep.subr.bf16.mxu0 %v1338_v0  ;;  %v1068_v54 = vpack.c.bf16 %v406_v52, %v405_v51  ;;  %v408_v57 = vld [vmem:[#allocation2 + $0x98] sm:$0xff]  ;;  %v409_v60 = vld [vmem:[#allocation2 + $0xa0] sm:$0xff]  ;;  %v410_v61 = vld [vmem:[#allocation2 + $0xa8] sm:$0xff]  ;;  %p1236_p10 = scmp.ne.s32.totalorder %s1553_s10, %s1235_s19  ;;  %s1241_s12 = scalar_lea.vmem %s1240_s11, 256 }
  0x47   : > { %v1071_v59 = vpack.c.bf16 %v408_v57, %v407_v56  ;;  %v1074_v62 = vpack.c.bf16 %v410_v61, %v409_v60  ;;  %v411_v63 = vld [vmem:[#allocation2 + $0xb0] sm:$0xff]  ;;  %v412_v2 = vld [vmem:[#allocation2 + $0xb8] sm:$0xff]  ;;  %v413_v4 = vld [vmem:[#allocation2 + $0xc0] sm:$0xff]  ;;  %p1242_p5 = scmp.lt.s32.totalorder %s1553_s10, %s1240_s11  ;;  %p1243_p6 = scmp.lt.s32.totalorder %s1241_s12, %s1235_s19 }
  0x48   : > { %v1077_v3 = vpack.c.bf16 %v412_v2, %v411_v63  ;;  %v414_v5 = vld [vmem:[#allocation2 + $0xc8] sm:$0xff]  ;;  %v415_v7 = vld [vmem:[#allocation2 + $0xd0] sm:$0xff]  ;;  %v416_v8 = vld [vmem:[#allocation2 + $0xd8] sm:$0xff]  ;;  %p1237_p0 = pnand %p1236_p10, %p1620_p12 }
  0x49   : > { %1054 = vmatpush3.bf16.msra.mxu0 %v1053_v13  ;;  %v1080_v6 = vpack.c.bf16 %v414_v5, %v413_v4  ;;  %v1083_v9 = vpack.c.bf16 %v416_v8, %v415_v7  ;;  %v417_v10 = vld [vmem:[#allocation2 + $0xe0] sm:$0xff]  ;;  %v418_v11 = vld [vmem:[#allocation2 + $0xe8] sm:$0xff]  ;;  %v419_v13 = vld [vmem:[#allocation2 + $0xf0] sm:$0xff]  ;;  %p1244_p7 = por %p1243_p6, %p1242_p5 }
  0x4a   : > { %1055 = vmatprep.subr.bf16.mxu0 %v1338_v0  ;;  %v1086_v12 = vpack.c.bf16 %v418_v11, %v417_v10  ;;  %v420_v14 = vld [vmem:[#allocation2 + $0xf8] sm:$0xff]  ;;  %v855_v18 = vld [vmem:[%s1605_s1 + $0x8] sm:$0xff]  ;;  %v237_v21 = vld [vmem:[%s1607_s3] sm:$0xff]  ;;  %p1238_p2 = pneg %p1237_p0 }
  0x4b   : > { %v1089_v15 = vpack.c.bf16 %v420_v14, %v419_v13 }
  0x4c   : > { %p1245_p9 = pnand %p1244_p7, %p1238_p2 }
  0x4d   : > { %1057 = vmatpush3.bf16.msra.mxu0 %v1056_v16 }
  0x4e   : > { %1058 = vmatprep.subr.bf16.mxu0 %v1338_v0 }
  0x51   : > { %1060 = vmatpush3.bf16.msra.mxu0 %v1059_v19 }
  0x52   : > { %1061 = vmatprep.subr.bf16.mxu0 %v1338_v0 }
  0x55   : > { %1063 = vmatpush3.bf16.msra.mxu0 %v1062_v22 }
  0x56   : > { %1064 = vmatprep.subr.bf16.mxu0 %v1338_v0 }
  0x59   : > { %1066 = vmatpush3.bf16.msra.mxu0 %v1065_v25 }
  0x5a   : > { %1091 = vmatprep.subr.bf16.mxu0 %v1338_v0 }
  0x5c   : > { %956 = vmatmul.mubr.f32.vlgmr.msra.gmra.mrb[0].mxu0 %v1496_v26 }
  0x5d   : > { %1035 = vmatprep.mubr.msk.f32.mxu0 %vm1339_vm0, %v1340_v1  ;;  %1093 = vmatpush3.bf16.msra.mxu0 %v1092_v29 }
  0x5e   : > { %1094 = vmatprep.subr.bf16.mxu0 %v1338_v0 }
  0x61   : > { %1096 = vmatpush3.bf16.msra.mxu0 %v1095_v32 }
  0x62   : > { %1097 = vmatprep.subr.bf16.mxu0 %v1338_v0 }
  0x65   : > { %1099 = vmatpush3.bf16.msra.mxu0 %v1098_v35 }
  0x66   : > { %1100 = vmatprep.subr.bf16.mxu0 %v1338_v0 }
  0x69   : > { %1102 = vmatpush3.bf16.msra.mxu0 %v1101_v38 }
  0x6a   : > { %1103 = vmatprep.subr.bf16.mxu0 %v1338_v0 }
  0x6d   : > { %1105 = vmatpush3.bf16.msra.mxu0 %v1104_v41 }
  0x6e   : > { %1106 = vmatprep.subr.bf16.mxu0 %v1338_v0 }
  0x71   : > { %1108 = vmatpush3.bf16.msra.mxu0 %v1107_v44 }
  0x72   : > { %1109 = vmatprep.subr.bf16.mxu0 %v1338_v0 }
  0x75   : > { %1111 = vmatpush3.bf16.msra.mxu0 %v1110_v47 }
  0x76   : > { %1112 = vmatprep.subr.bf16.mxu0 %v1338_v0 }
  0x79   : > { %1114 = vmatpush3.bf16.msra.mxu0 %v1113_v50 }
  0x7c   : > { %1036 = vmatmul.mubr.f32.vlgmr.msra.gmra.mrb[2].mxu0 %v1496_v26 }
 0x12f   : > { %v320_v55 = vpop.f32.mrb[0].mxu0 }
 0x130   : > { %v957_v58 = vpop.f32.mrb[1].mxu0  ;;  %959 = vmatpush3.msk.msra.mxu1 %vm329_vm1, %v320_v55 }
 0x131   : > { %1067 = vmatprep.subr.bf16.mxu1 %v1338_v0  ;;  %961 = vmatmul.mubr.msk.f32.vlgmr.msra.gmra.mrb[0].mxu1 %vm325_vm2, %v324_v53 }
 0x132   : > { %1069 = vmatpush3.bf16.msra.mxu1 %v1068_v54  ;;  %995 = vmatprep.mubr.msk.f32.mxu1 %vm1339_vm0, %v1340_v1 }
 0x133   : > { %1070 = vmatprep.subr.bf16.mxu1 %v1338_v0 }
 0x136   : > { %1072 = vmatpush3.bf16.msra.mxu1 %v1071_v59 }
 0x137   : > { %1073 = vmatprep.subr.bf16.mxu1 %v1338_v0 }
 0x13a   : > { %1075 = vmatpush3.bf16.msra.mxu1 %v1074_v62 }
 0x13b   : > { %1076 = vmatprep.subr.bf16.mxu1 %v1338_v0 }
 0x13e   : > { %1078 = vmatpush3.bf16.msra.mxu1 %v1077_v3 }
 0x13f   : > { %1079 = vmatprep.subr.bf16.mxu1 %v1338_v0 }
 0x142   : > { %1081 = vmatpush3.bf16.msra.mxu1 %v1080_v6 }
 0x143   : > { %1082 = vmatprep.subr.bf16.mxu1 %v1338_v0 }
 0x146   : > { %1084 = vmatpush3.bf16.msra.mxu1 %v1083_v9 }
 0x147   : > { %1085 = vmatprep.subr.bf16.mxu1 %v1338_v0 }
 0x14a   : > { %1087 = vmatpush3.bf16.msra.mxu1 %v1086_v12 }
 0x14b   : > { %1088 = vmatprep.subr.bf16.mxu1 %v1338_v0  ;;  %v858_v0 = vld [vmem:[%s1605_s1 + $0x10] sm:$0xff] }
 0x14e   : > { %1090 = vmatpush3.bf16.msra.mxu1 %v1089_v15 }
 0x14f   : > { %998 = vmatprep.subr.mxu1 %v1340_v1  ;;  %v653_v16 = vpop.f32.mrb[2].mxu0 }
 0x150   : > { %v1037_v17 = vpop.f32.mrb[3].mxu0 }
 0x151   : > { %996 = vmatmul.mubr.f32.vlgmr.msra.gmra.mrb[2].mxu1 %v1496_v26 }
 0x152   : > { %1000 = vmatprep.mubr.msk.f32.mxu1 %vm1339_vm0, %v1340_v1 }
 0x224   : > { %v487_v19 = vpop.f32.mrb[2].mxu1 }
 0x225   : > { %v997_v20 = vpop.f32.mrb[3].mxu1  ;;  %999 = vmatpush3.msk.msra.mxu1 %vm329_vm1, %v487_v19 }
 0x226   : > { %1001 = vmatmul.mubr.msk.f32.vlgmr.msra.gmra.mrb[0].mxu1 %vm325_vm2, %v855_v18  ;;  %1038 = vmatprep.subr.mxu1 %v1340_v1 }
 0x227   : > { %1039 = vmatpush3.msk.msra.mxu1 %vm329_vm1, %v653_v16  ;;  %1040 = vmatprep.mubr.msk.f32.mxu1 %vm1339_vm0, %v1340_v1 }
 0x22e   : > { %1041 = vmatmul.mubr.msk.f32.vlgmr.msra.gmra.mrb[0].mxu1 %vm325_vm2, %v858_v0 }
 0x301   : > { %v731_v22 = vpop.f32.mrb[0].mxu1 }
 0x302   : > { %v1115_v1 = vadd.f32 %v731_v22, %v237_v21  ;;  %v1042_v23 = vpop.f32.mrb[1].mxu1 }
 0x304   : > { %736 = vst [vmem:[%s227_s6] sm:$0xff] %v1115_v1 }
 0x305   : > { %1248 = shalt.err (!%p1245_p9)
}
 0x306   : > { %s1249_s8 = scalar_lea.hbm %s1551_s24, 128  ;;  %s1253_s27 = scalar_lea.hbm %s1608_s4, 512 }
 0x307   : > { %p1250_p11 = scmp.ne.s32.totalorder %s1551_s24, %s1249_s8  ;;  %p1254_p4 = scmp.lt.u32.totalorder %s1551_s24, %s1608_s4 }
 0x308   : > { %p1255_p3 = scmp.lt.u32.totalorder %s1253_s27, %s1249_s8  ;;  %p1257_p10 = scmp.lt.u32.totalorder %s1249_s8, %s1551_s24 }
 0x309   : > { %p1251_p13 = pnand %p1250_p11, %p1620_p12 }
 0x30a   : > { %p1256_p8 = por %p1255_p3, %p1254_p4 }
 0x30b   : > { %p1252_p1 = pneg %p1251_p13 }
 0x30c   : > { %p1258_p0 = por %p1257_p10, %p1256_p8 }
 0x30e   : > { %p1259_p2 = pnand %p1258_p0, %p1252_p1 }
 0x310   : > { %1262 = shalt.err (!%p1259_p2)
}
 0x311   : > { %1124 = dma.vmem_to_hbm [thread:$0]  (%p1620_p12), %s1553_s10, 128, %s1551_s24, %s738_s18  }
 0x312 PF: > { %p1136_p5 = scmp.ge.s32.totalorder %s1333_s22, 2  ;;  %s765_s13 = sand.u32 1, %s1305_s15  }
 0x313   : > { %p1621_p6 = scmp.ne.s32.totalorder %s1614_s30, 0  ;;  %s766_s14 = scalar_lea.sflag [#allocation4], %s765_s13 }
 0x315   : > { %p1131_p7 = pnand %p1136_p5, %p1621_p6 }
 0x317   : > { %1300 = dma.done.wait (!%p1131_p7), %s766_s14, 128  }
 0x318   : > { %1302 = vsyncadd (!%p1131_p7), %s766_s14, 4294967168  ;;  %s18_s22 = sadd.s32 1, %s1333_s22   ;;  %s1622_s15 = smov %s1309_s16 }
 0x319   : > { %p15_p9 = scmp.ge.s32.totalorder %s18_s22, 6   ;;  %s1623_s16 = smov %s1313_s17 }
 0x31a   : > { %s1624_s17 = smov %s1446_s9  ;;  %s1625_s18 = smov %s1325_s20 }
 0x31b   : > { %s1626_s19 = smov %s1329_s21  ;;  %s1627_s20 = smov %s1630_s25 }
 0x31c   : > { %s1628_s21 = smov %s1634_s26  ;;  %17 = sbr.rel (!%p15_p9) target bundleno = 6 (0x6), region = 80 }
 0x323   :  { %771 = vsyncpa [#allocation3], 1 }
 0x324   :  { %773 = vsyncpa [#allocation3 + $0x1], 1 }
 0x325   :  { %774 = vsyncpa [#allocation4], 1 }
 0x326   :  { %776 = vsyncpa [#allocation4 + $0x1], 1 }

</bundles_post_ra>
